<compile_context>
chip_gen: v7x
topology: tpu7x:2x2x1
jax: 0.10.0
libtpu: 0.0.40
codegen_flags: <defaults>
</compile_context>

<pallas_src>
import jax
import jax.numpy as jnp
from jax.experimental import pallas as pl
from jax.experimental.pallas import tpu as pltpu


def se_kernel(x_ref, w1s_ref, b1_ref, w2t_ref, b2_ref, o_ref):
    # x_ref:  (Bt, C, HW)   w1s_ref: (C, Cr)  (already scaled by 1/HW)
    # b1_ref: (1, Cr)       w2t_ref: (Cr, C)  b2_ref: (1, C)
    # o_ref:  (Bt, C, HW)

    # Squeeze: global sum pool over spatial (lane axis, XLU reduction);
    # 1/HW is folded into w1s.  Accumulate in f32 without materializing a
    # full f32 copy of the block.
    y = jnp.sum(x_ref[...], axis=-1, dtype=jnp.float32)          # (Bt, C)

    # Excitation MLP: Linear -> ReLU -> Linear -> Sigmoid (C already on lanes).
    h = jnp.dot(y, w1s_ref[...],
                preferred_element_type=jnp.float32) + b1_ref[...]  # (Bt, Cr)
    h = jnp.maximum(h, 0.0)
    s = jnp.dot(h, w2t_ref[...],
                preferred_element_type=jnp.float32) + b2_ref[...]  # (Bt, C)
    s = jax.nn.sigmoid(s)

    # Scale: re-read x (cheap VMEM reload, cuts vreg pressure), broadcast the
    # per-channel gate over spatial lanes, multiply in f32, cast on the store.
    o_ref[...] = (x_ref[...] * s[:, :, None]).astype(o_ref.dtype)


def _vmem_capacity_bytes():
    """Generation-aware VMEM capacity; conservative (v7x) fallback."""
    try:
        cap = int(getattr(pltpu.get_tpu_info(), "vmem_capacity_bytes", 0))
        if cap > 0:
            return cap
    except Exception:
        pass
    return 64 * 1024 * 1024


def _choose_bt(B, per_img_bytes, vmem_block_budget,
               min_grid_steps=8, min_block_bytes=2 * 1024 * 1024):
    """Pick the per-step batch tile Bt.

    Constraints (in priority order):
      * in+out blocks, each double-buffered, fit `vmem_block_budget`,
      * enough grid steps (>= min_grid_steps when B allows) so both v7x
        TensorCores each pipeline several blocks,
      * blocks >= ~min_block_bytes so the ~0.35us/step grid overhead and
        small-DMA inefficiency stay negligible,
      * always >= 2 grid steps when B >= 2 (megacore + pipeline overlap).
    Non-divisor Bt is fine: the grid uses pl.cdiv and a ragged last block.
    """
    per_img = max(1, per_img_bytes)
    cap = max(1, vmem_block_budget // (4 * per_img))   # in+out, double-buffered
    cap = min(cap, B)
    bt_steps = max(1, B // min_grid_steps)              # -> ~min_grid_steps steps
    bt_bytes = -(-min_block_bytes // per_img)           # -> blocks >= min size
    bt = min(cap, max(bt_steps, min(bt_bytes, cap)))
    if B >= 2:
        bt = min(bt, (B + 1) // 2)                      # keep >= 2 grid steps
    return max(1, bt)


@jax.jit
def se_layer(x, w1, b1, w2, b2):
    """x: (B, C, H, W); weights follow PyTorch nn.Linear convention:
       w1: (C//r, C), b1: (C//r,), w2: (C, C//r), b2: (C,)."""
    B, C, H, W = x.shape
    HW = H * W
    Cr = w1.shape[0]

    # Native NCHW layout: flatten spatial only (free reshape, no relayout).
    xf = x.reshape(B, C, HW)

    # Fold the mean's 1/HW into the first (transposed) weight.
    w1s = (w1.T * (1.0 / HW)).astype(jnp.float32)      # (C, Cr)
    w2t = w2.T.astype(jnp.float32)                     # (Cr, C)
    b1_2d = b1.reshape(1, Cr).astype(jnp.float32)
    b2_2d = b2.reshape(1, C).astype(jnp.float32)

    itemsize = jnp.dtype(x.dtype).itemsize
    per_img = C * HW * itemsize

    vmem_cap = _vmem_capacity_bytes()
    block_budget = max(8 * 1024 * 1024, vmem_cap // 2)
    Bt = _choose_bt(B, per_img, block_budget)
    grid = (pl.cdiv(B, Bt),)

    # Tight, shape-derived VMEM limit (leaves headroom for Mosaic scratch).
    weight_bytes = 4 * (C * Cr + Cr + Cr * C + C)
    vmem_need = 4 * Bt * per_img + 2 * weight_bytes + (4 << 20)
    vmem_limit = int(min(vmem_cap - (4 << 20), max(vmem_need, 16 << 20)))

    flops = 2 * B * HW * C + 4 * B * C * Cr            # pool + scale + 2 dots
    bytes_accessed = 2 * B * HW * C * itemsize + weight_bytes
    cost = pl.CostEstimate(flops=flops,
                           transcendentals=B * C,      # sigmoid
                           bytes_accessed=bytes_accessed)

    out = pl.pallas_call(
        se_kernel,
        out_shape=jax.ShapeDtypeStruct((B, C, HW), x.dtype),
        grid=grid,
        in_specs=[
            pl.BlockSpec((Bt, C, HW), lambda b: (b, 0, 0)),
            pl.BlockSpec((C, Cr), lambda b: (0, 0)),
            pl.BlockSpec((1, Cr), lambda b: (0, 0)),
            pl.BlockSpec((Cr, C), lambda b: (0, 0)),
            pl.BlockSpec((1, C), lambda b: (0, 0)),
        ],
        out_specs=pl.BlockSpec((Bt, C, HW), lambda b: (b, 0, 0)),
        compiler_params=pltpu.CompilerParams(
            dimension_semantics=("parallel",),
            vmem_limit_bytes=vmem_limit,
        ),
        cost_estimate=cost,
    )(xf, w1s, b1_2d, w2t, b2_2d)

    return out.reshape(B, C, H, W)


def se_layer_ref(x, w1, b1, w2, b2):
    """Plain-JAX reference matching the PyTorch forward."""
    y = jnp.mean(x, axis=(2, 3))                       # (B, C)
    y = jnp.maximum(y @ w1.T + b1, 0.0)                # (B, C//r)
    y = jax.nn.sigmoid(y @ w2.T + b2)                  # (B, C)
    return x * y[:, :, None, None]


if __name__ == "__main__":
    reduction = 16

    def make_inputs(B, C, H, W, seed=0):
        Cr = max(1, C // reduction)
        key = jax.random.PRNGKey(seed)
        kx, k1, k2, k3, k4 = jax.random.split(key, 5)
        x = jax.random.normal(kx, (B, C, H, W), dtype=jnp.float32)
        # Deterministic synthetic parameters (shapes from nn.Linear in __init__).
        w1 = jax.random.normal(k1, (Cr, C), dtype=jnp.float32) * 0.1
        b1 = jax.random.normal(k2, (Cr,), dtype=jnp.float32) * 0.1
        w2 = jax.random.normal(k3, (C, Cr), dtype=jnp.float32) * 0.1
        b2 = jax.random.normal(k4, (C,), dtype=jnp.float32) * 0.1
        return x, w1, b1, w2, b2

    # Case 1: small divisible batch.
    x, w1, b1, w2, b2 = make_inputs(2, 32, 16, 16, seed=0)
    out = jax.block_until_ready(se_layer(x, w1, b1, w2, b2))
    ref = se_layer_ref(x, w1, b1, w2, b2)
    assert out.shape == x.shape
    assert jnp.allclose(out, ref, atol=1e-4, rtol=1e-4), "mismatch (B=2)"

    # Case 2: batch that does not divide the block tile -> ragged last block.
    x, w1, b1, w2, b2 = make_inputs(3, 32, 16, 16, seed=1)
    out = jax.block_until_ready(se_layer(x, w1, b1, w2, b2))
    ref = se_layer_ref(x, w1, b1, w2, b2)
    assert jnp.allclose(out, ref, atol=1e-4, rtol=1e-4), "mismatch (B=3, ragged)"

    print("KERNEL_OK")
</pallas_src>

<mosaic_0001>
module attributes {stable_mosaic.version = 11 : i64} {
  func.func @se_kernel(%arg0: i32, %arg1: memref<1x32x256xf32, #tpu.memory_space<vmem>>, %arg2: memref<32x2xf32, #tpu.memory_space<vmem>>, %arg3: memref<1x2xf32, #tpu.memory_space<vmem>>, %arg4: memref<2x32xf32, #tpu.memory_space<vmem>>, %arg5: memref<1x32xf32, #tpu.memory_space<vmem>>, %arg6: memref<1x32x256xf32, #tpu.memory_space<vmem>>) attributes {dimension_semantics = [#tpu.dimension_semantics<parallel>], iteration_bounds = array<i64: 2>, scalar_prefetch = 0 : i64, scratch_operands = 0 : i64, tpu.core_type = #tpu.core_type<tc>, window_params = [{transform_indices = @transform_0, window_bounds = array<i64: 1, 32, 256>}, {pipeline_mode = #tpu.pipeline_mode<synchronous>, transform_indices = @transform_1, window_bounds = array<i64: 32, 2>}, {pipeline_mode = #tpu.pipeline_mode<synchronous>, transform_indices = @transform_2, window_bounds = array<i64: 1, 2>}, {pipeline_mode = #tpu.pipeline_mode<synchronous>, transform_indices = @transform_3, window_bounds = array<i64: 2, 32>}, {pipeline_mode = #tpu.pipeline_mode<synchronous>, transform_indices = @transform_4, window_bounds = array<i64: 1, 32>}, {transform_indices = @transform_5, window_bounds = array<i64: 1, 32, 256>}]} {
    %c0 = arith.constant 0 : index
    %c0_0 = arith.constant 0 : index
    %c0_1 = arith.constant 0 : index
    %0 = vector.load %arg1[%c0, %c0_0, %c0_1] : memref<1x32x256xf32, #tpu.memory_space<vmem>>, vector<1x32x256xf32>
    %cst = arith.constant dense<0.000000e+00> : vector<1x32xf32>
    %1 = vector.multi_reduction <add>, %0, %cst [2] : vector<1x32x256xf32> to vector<1x32xf32>
    %c0_2 = arith.constant 0 : index
    %c0_3 = arith.constant 0 : index
    %2 = vector.load %arg2[%c0_2, %c0_3] : memref<32x2xf32, #tpu.memory_space<vmem>>, vector<32x2xf32>
    %cst_4 = arith.constant dense<0.000000e+00> : vector<1x2xf32>
    %3 = tpu.matmul %1, %2, %cst_4 {dimension_numbers = #tpu.dot_dimension_numbers<[1], [0], [0], [1], [0, 0, 1, 1], [], []>} : vector<1x32xf32>, vector<32x2xf32>, vector<1x2xf32> -> vector<1x2xf32>
    %c0_5 = arith.constant 0 : index
    %c0_6 = arith.constant 0 : index
    %4 = vector.load %arg3[%c0_5, %c0_6] : memref<1x2xf32, #tpu.memory_space<vmem>>, vector<1x2xf32>
    %5 = arith.addf %3, %4 : vector<1x2xf32>
    %cst_7 = arith.constant 0.000000e+00 : f32
    %6 = vector.broadcast %cst_7 : f32 to vector<1x2xf32>
    %7 = arith.maximumf %5, %6 : vector<1x2xf32>
    %c0_8 = arith.constant 0 : index
    %c0_9 = arith.constant 0 : index
    %8 = vector.load %arg4[%c0_8, %c0_9] : memref<2x32xf32, #tpu.memory_space<vmem>>, vector<2x32xf32>
    %cst_10 = arith.constant dense<0.000000e+00> : vector<1x32xf32>
    %9 = tpu.matmul %7, %8, %cst_10 {dimension_numbers = #tpu.dot_dimension_numbers<[1], [0], [0], [1], [0, 0, 1, 1], [], []>} : vector<1x2xf32>, vector<2x32xf32>, vector<1x32xf32> -> vector<1x32xf32>
    %c0_11 = arith.constant 0 : index
    %c0_12 = arith.constant 0 : index
    %10 = vector.load %arg5[%c0_11, %c0_12] : memref<1x32xf32, #tpu.memory_space<vmem>>, vector<1x32xf32>
    %11 = arith.addf %9, %10 : vector<1x32xf32>
    %12 = arith.negf %11 : vector<1x32xf32>
    %13 = math.exp %12 : vector<1x32xf32>
    %cst_13 = arith.constant 1.000000e+00 : f32
    %14 = vector.broadcast %cst_13 : f32 to vector<1x32xf32>
    %15 = arith.addf %14, %13 : vector<1x32xf32>
    %16 = arith.divf %14, %15 : vector<1x32xf32>
    %c0_14 = arith.constant 0 : index
    %c0_15 = arith.constant 0 : index
    %c0_16 = arith.constant 0 : index
    %17 = vector.load %arg1[%c0_14, %c0_15, %c0_16] : memref<1x32x256xf32, #tpu.memory_space<vmem>>, vector<1x32x256xf32>
    %18 = vector.shape_cast %16 : vector<1x32xf32> to vector<1x32x1xf32>
    %19 = vector.broadcast %18 : vector<1x32x1xf32> to vector<1x32x256xf32>
    %20 = arith.mulf %17, %19 : vector<1x32x256xf32>
    %c0_17 = arith.constant 0 : index
    %c0_18 = arith.constant 0 : index
    %c0_19 = arith.constant 0 : index
    %21 = vector.load %arg6[%c0_17, %c0_18, %c0_19] : memref<1x32x256xf32, #tpu.memory_space<vmem>>, vector<1x32x256xf32>
    tpu.vector_store %arg6[%c0_17, %c0_18, %c0_19], %20 {strides = array<i32>} : memref<1x32x256xf32, #tpu.memory_space<vmem>>, vector<1x32x256xf32>,
    return
  }
  func.func @transform_0(%arg0: i32) -> (i32, i32, i32) {
    %c0_i32 = arith.constant 0 : i32
    %c0_i32_0 = arith.constant 0 : i32
    %c0_i32_1 = arith.constant 0 : i32
    return %arg0, %c0_i32, %c0_i32_0 : i32, i32, i32
  }
  func.func @transform_1(%arg0: i32) -> (i32, i32) {
    %c0_i32 = arith.constant 0 : i32
    %c0_i32_0 = arith.constant 0 : i32
    %c0_i32_1 = arith.constant 0 : i32
    return %c0_i32, %c0_i32_0 : i32, i32
  }
  func.func @transform_2(%arg0: i32) -> (i32, i32) {
    %c0_i32 = arith.constant 0 : i32
    %c0_i32_0 = arith.constant 0 : i32
    %c0_i32_1 = arith.constant 0 : i32
    return %c0_i32, %c0_i32_0 : i32, i32
  }
  func.func @transform_3(%arg0: i32) -> (i32, i32) {
    %c0_i32 = arith.constant 0 : i32
    %c0_i32_0 = arith.constant 0 : i32
    %c0_i32_1 = arith.constant 0 : i32
    return %c0_i32, %c0_i32_0 : i32, i32
  }
  func.func @transform_4(%arg0: i32) -> (i32, i32) {
    %c0_i32 = arith.constant 0 : i32
    %c0_i32_0 = arith.constant 0 : i32
    %c0_i32_1 = arith.constant 0 : i32
    return %c0_i32, %c0_i32_0 : i32, i32
  }
  func.func @transform_5(%arg0: i32) -> (i32, i32, i32) {
    %c0_i32 = arith.constant 0 : i32
    %c0_i32_0 = arith.constant 0 : i32
    %c0_i32_1 = arith.constant 0 : i32
    return %arg0, %c0_i32, %c0_i32_0 : i32, i32, i32
  }
}

</mosaic_0001>

<bundles_post_ra>
// kernel: se_layer.1
= control target key start
LH: loop header
LB: loop body
LE: loop exit
PB: predicated region body
PF: predicated region fallthrough
CT: control target
= control target key end

     0   :  { %s633_s18 = smov 0   ;;  %s710_s0 = inlined_call_operand.vmem [shape: f32[2,32,256], index: 0, kind: input, shape index: {}]   ;;  %s711_s1 = inlined_call_operand.vmem [shape: f32[32,2], index: 1, kind: input, shape index: {}]   ;;  %s712_s2 = inlined_call_operand.vmem [shape: f32[1,2], index: 2, kind: input, shape index: {}]   ;;  %s713_s3 = inlined_call_operand.vmem [shape: f32[2,32], index: 3, kind: input, shape index: {}]   ;;  %s714_s4 = inlined_call_operand.vmem [shape: f32[1,32], index: 4, kind: input, shape index: {}]   ;;  %s715_s5 = inlined_call_operand.vmem [shape: f32[2,32,256], index: 5, kind: output, shape index: {}]  }
   0x1 LB: > { %s531_s19 = sadd.s32 4294967295, %s598_s18   ;;  %p535_p0 = scmp.ge.s32.totalorder %s598_s18, 1  ;;  %s598_s18 = sphi %s633_s18, %s15_s18  }
   0x2   : > { %p187_p1 = scmp.lt.s32.totalorder %s598_s18, 3 }
   0x4   : > { %p188_p2 = pnand %p535_p0, %p187_p1 }
   0x5   : > { %p215_p3 = scmp.lt.s32.totalorder (!%p188_p2), %s531_s19, 1  ;;  %v245_v12 = vld [vmem:[%s711_s1] sm:$0xff] (!%p188_p2)  ;;  %v246_v13 = vld [vmem:[%s711_s1 + $0x8] sm:$0xff] (!%p188_p2)  ;;  %v600_v15 = vmov (!%p188_p2), 0.0|0.0   ;;  %v247_v16 = vld [vmem:[%s711_s1 + $0x10] sm:$0xff] (!%p188_p2)  ;;  %vm601_vm0 = vmmov (!%p188_p2), 0   ;;  %v254_v20 = vlaneseq (!%p188_p2) }
   0x6   : > { %191 = sbr.rel (%p188_p2) target bundleno = 754 (0x2f2), region = 40  ;;  %v572_v14 = vpack.c.bf16 (!%p188_p2), %v246_v13, %v245_v12  ;;  %571 = vmatprep.subr.bf16.mxu0 (!%p188_p2), %v600_v15  ;;  %v248_v17 = vld [vmem:[%s711_s1 + $0x18] sm:$0xff] (!%p188_p2)  ;;  %v602_v19 = vmov (!%p188_p2), 0.0   ;;  %vm265_vm1 = vcmask (!%p188_p2), 130112   ;;  %vm272_vm2 = vcmask (!%p188_p2), 195712  }
   0x7   : > { %v575_v18 = vpack.c.bf16 (!%p188_p2), %v248_v17, %v247_v16  ;;  %563 = vmatprep.mubr.msk.f32.mxu0 (!%p188_p2), %vm601_vm0, %v602_v19  ;;  %566 = vmatprep.subr.mxu1 (!%p188_p2), %v602_v19  ;;  %v255_v21 = vand.u32 (!%p188_p2), 127, %v254_v20  ;;  %v257_v22 = vshrl.u32 (!%p188_p2), %v254_v20, 7  ;;  %vm279_vm3 = vcmask (!%p188_p2), 261312   ;;  %v355_v41 = vld [vmem:[%s713_s3] sm:$0x3] (!%p188_p2) }
   0x8   : > { %573 = vmatpush3.bf16.msra.mxu0 (!%p188_p2), %v572_v14  ;;  %568 = vmatprep.mubr.msk.f32.mxu1 (!%p188_p2), %vm601_vm0, %v602_v19  ;;  %vm281_vm4 = vcmask (!%p188_p2), 261120   ;;  %vm361_vm5 = vcmask (!%p188_p2), 1041408   ;;  %v249_v42 = vld [vmem:[%s712_s2] sm:$0x1] (!%p188_p2)  ;;  %vm357_vm6 = vcmask (!%p188_p2), 15360  }
   0x9   : > { %574 = vmatprep.subr.bf16.mxu0 (!%p188_p2), %v600_v15  ;;  %v260_v23 = vadd.s32 (!%p188_p2), 4294967288, %v255_v21  ;;  %v267_v24 = vadd.s32 (!%p188_p2), 4294967280, %v255_v21  ;;  %v274_v25 = vadd.s32 (!%p188_p2), 4294967272, %v255_v21  ;;  %v258_v27 = vsub.s32 (!%p188_p2), %v255_v21, %v257_v22  ;;  %567 = vmatpush3.msk.msra.mxu1 (!%p188_p2), %vm361_vm5, %v355_v41  ;;  %v356_v47 = vld [vmem:[%s714_s4] sm:$0x1] (!%p188_p2) }
   0xa   : > { %v443_v54 = vsub.s32 (!%p188_p2), 0, %v257_v22 }
   0xb   : > { %v263_v29 = vsub.s32 (!%p188_p2), %v260_v23, %v257_v22  ;;  %v270_v30 = vsub.s32 (!%p188_p2), %v267_v24, %v257_v22  ;;  %v277_v31 = vsub.s32 (!%p188_p2), %v274_v25, %v257_v22 }
   0xc   : > { %576 = vmatpush3.bf16.msra.mxu0 (!%p188_p2), %v575_v18 }
   0xd   : > { %s717_s19 = smov (!%p215_p3, %s531_s19), 1 }
   0xe   : > { %s546_s20 = sshll.u32 %s717_s19, 6 }
   0xf   : > { %s219_s23 = scalar_lea.vmem %s710_s0, %s546_s20  ;;  %s224_s15 = scalar_lea.vmem %s715_s5, %s546_s20 }
  0x10   : > { %v649_v0 = vld [vmem:[%s219_s23] sm:$0xff]  ;;  %v651_v1 = vld [vmem:[%s219_s23 + $0x8] sm:$0xff]  ;;  %v659_v5 = vld [vmem:[%s219_s23 + $0x10] sm:$0xff] }
  0x11   : > { %v653_v2 = vld [vmem:[%s219_s23 + $0x20] sm:$0xff]  ;;  %v233_v3 = vadd.f32 %v651_v1, %v649_v0  ;;  %v657_v4 = vld [vmem:[%s219_s23 + $0x28] sm:$0xff]  ;;  %v661_v6 = vld [vmem:[%s219_s23 + $0x18] sm:$0xff] }
  0x12   : > { %v239_v7 = vadd.f32 %v657_v4, %v653_v2  ;;  %v665_v8 = vld [vmem:[%s219_s23 + $0x30] sm:$0xff]  ;;  %v667_v9 = vld [vmem:[%s219_s23 + $0x38] sm:$0xff]  ;;  %v236_v10 = vadd.f32 %v661_v6, %v659_v5 }
  0x13   : > { %234 = vadd.xlane.f32.xlu0 %v233_v3  ;;  %v242_v11 = vadd.f32 %v667_v9, %v665_v8 }
  0x14   : > { %240 = vadd.xlane.f32.xlu1 %v239_v7 }
  0x17   : > { %237 = vadd.xlane.f32.xlu0 %v236_v10 }
  0x18   : > { %243 = vadd.xlane.f32.xlu1 %v242_v11 }
  0xa0   : > { %v235_v26 = vpop.xlane.xlu0 %234 }
  0xa1   : > { %v241_v28 = vpop.xlane.xlu1 %240  ;;  %v259_v33 = vrot.slane %v235_v26, %v258_v27 }
  0xa2   : > { %v271_v36 = vrot.slane %v241_v28, %v270_v30 }
  0xa4   : > { %v238_v32 = vpop.xlane.xlu0 %237 }
  0xa5   : > { %v264_v34 = vrot.slane %v238_v32, %v263_v29  ;;  %v244_v35 = vpop.xlane.xlu1 %243 }
  0xa6   : > { %v278_v37 = vrot.slane %v244_v35, %v277_v31 }
  0xa7   : > { %v266_v38 = vsel %vm265_vm1, %v264_v34, %v259_v33 }
  0xa8   : > { %v273_v39 = vsel %vm272_vm2, %v271_v36, %v266_v38 }
  0xa9   : > { %v280_v40 = vsel %vm279_vm3, %v278_v37, %v273_v39 }
  0xaa   : > { %564 = vmatmul.mubr.msk.f32.vlgmr.msra.gmra.mrb[0].mxu0 %vm281_vm4, %v280_v40 }
 0x17d   : > { %v350_v43 = vpop.f32.mrb[0].mxu0 }
 0x17e   : > { %v351_v44 = vadd.f32 %v350_v43, %v249_v42  ;;  %v565_v45 = vpop.f32.mrb[1].mxu0 }
 0x180   : > { %v354_v46 = vmax.f32 %v351_v44, 0.0 }
 0x182   : > { %569 = vmatmul.mubr.msk.f32.vlgmr.msra.gmra.mrb[0].mxu1 %vm357_vm6, %v354_v46 }
 0x255   : > { %v431_v48 = vpop.f32.mrb[0].mxu1 }
 0x256   : > { %v432_v49 = vadd.f32 %v431_v48, %v356_v47  ;;  %v570_v50 = vpop.f32.mrb[1].mxu1 }
 0x258   : > { %v543_v51 = vmul.f32 -1.442695, %v432_v49 }
 0x25a   : > { %588 = vpow2.f32 %v543_v51 }
 0x264   : > { %v589_v52 = vpop.eup %588 }
 0x265   : > { %v438_v53 = vadd.f32 1.0, %v589_v52 }
 0x267   : > { %590 = vrcp.f32 %v438_v53 }
 0x271   : > { %v591_v55 = vpop.eup %590 }
 0x272   : > { %v444_v56 = vrot.slane %v591_v55, %v443_v54 }
 0x274   : > { %450 = vbcast.lane.b32.xlu1 %v444_v56, 264  ;;  %446 = vbcast.lane.b32.xlu0 %v444_v56, 256 }
 0x278   : > { %454 = vbcast.lane.b32.xlu1 %v444_v56, 272 }
 0x27c   : > { %458 = vbcast.lane.b32.xlu1 %v444_v56, 280 }
 0x2e6   : > { %v451_v57 = vpop.permute.xlu1 %450  ;;  %v447_v58 = vpop.permute.xlu0 %446 }
 0x2e7   : > { %v462_v59 = vmul.f32 %v451_v57, %v659_v5  ;;  %v463_v60 = vmul.f32 %v451_v57, %v661_v6  ;;  %v460_v61 = vmul.f32 %v447_v58, %v649_v0  ;;  %v461_v62 = vmul.f32 %v447_v58, %v651_v1 }
 0x2e9   : > { %470 = vst [vmem:[%s224_s15 + $0x10] sm:$0xff] %v462_v59  ;;  %471 = vst [vmem:[%s224_s15 + $0x18] sm:$0xff] %v463_v60 }
 0x2ea   : > { %468 = vst [vmem:[%s224_s15] sm:$0xff] %v460_v61  ;;  %469 = vst [vmem:[%s224_s15 + $0x8] sm:$0xff] %v461_v62  ;;  %v455_v63 = vpop.permute.xlu1 %454 }
 0x2eb   : > { %v464_v3 = vmul.f32 %v455_v63, %v653_v2  ;;  %v465_v7 = vmul.f32 %v455_v63, %v657_v4 }
 0x2ed   : > { %472 = vst [vmem:[%s224_s15 + $0x20] sm:$0xff] %v464_v3  ;;  %473 = vst [vmem:[%s224_s15 + $0x28] sm:$0xff] %v465_v7 }
 0x2ee   : > { %v459_v10 = vpop.permute.xlu1 %458 }
 0x2ef   : > { %v466_v5 = vmul.f32 %v459_v10, %v665_v8  ;;  %v467_v6 = vmul.f32 %v459_v10, %v667_v9 }
 0x2f1   : > { %474 = vst [vmem:[%s224_s15 + $0x30] sm:$0xff] %v466_v5  ;;  %475 = vst [vmem:[%s224_s15 + $0x38] sm:$0xff] %v467_v6 }
 0x2f2 PF: > { %s15_s18 = sadd.s32 1, %s598_s18  }
 0x2f3   : > { %p12_p4 = scmp.ge.s32.totalorder %s15_s18, 4  }
 0x2f5   :  { %14 = sbr.rel (!%p12_p4) target bundleno = 1 (0x1), region = 70 }

</bundles_post_ra>
